<compile_context>
chip_gen: v7x
topology: tpu7x:2x2x1
jax: 0.10.0
libtpu: 0.0.40
codegen_flags: <defaults>
</compile_context>

<pallas_src>
import functools
import math

import jax
import jax.numpy as jnp
from jax.experimental import pallas as pl
from jax.experimental.pallas import tpu as pltpu


def _ape_ope_kernel(x_ref, ids_ref, const_ref, o_ref, *,
                    num_extra_tokens, tile_rows, grid_size):
    """Fused positional-embedding build + add for one (seq-tile, batch) step.

    x_ref     : (1, TS, E)  input embeddings tile
    ids_ref   : (1, TS, 1)  object ids (f32), zero-padded over the prefix rows
    const_ref : (5, E)      per-lane constants: [omega, phase, m_obj, m_x, m_y]
    o_ref     : (1, TS, E)  output tile
    """
    consts = const_ref[...]                         # (5, E) f32
    omega = consts[0:1, :]                          # (1, E)
    phase = consts[1:2, :]                          # (1, E)  0 or pi/2 per lane
    m_obj = consts[2:3, :]                          # (1, E)  obj-id lanes mask
    m_x = consts[3:4, :]                            # (1, E)  x-coordinate lanes
    m_y = consts[4:5, :]                            # (1, E)  y-coordinate lanes

    # Global row index for this sequence tile (seq-tile axis is grid dim 0).
    row = (jax.lax.broadcasted_iota(jnp.int32, (tile_rows, 1), 0)
           + pl.program_id(0) * tile_rows)                       # (TS, 1) i32
    pos = jnp.maximum(row - num_extra_tokens, 0).astype(jnp.float32)

    # gx = pos // grid_size, gy = pos % grid_size  (exact float trick; the +0.5
    # margin keeps floor() exact for any reasonable grid_size, not just pow2).
    gx = jnp.floor((pos + 0.5) * (1.0 / grid_size))              # (TS, 1)
    gy = pos - gx * grid_size                                    # (TS, 1)

    ids = ids_ref[0]                                             # (TS, 1) f32

    # Per-lane coordinate: object id on the first E/2 lanes, grid-x on the next
    # E/4, grid-y on the last E/4.  Then the whole PE in one lane-dense slab:
    #   pe = sin(coord * omega + phase)   (cos == sin(. + pi/2))
    coord = ids * m_obj + gx * m_x + gy * m_y                    # (TS, E)
    pe = jnp.sin(coord * omega + phase)                          # (TS, E)

    if num_extra_tokens > 0:
        # Extra ([cls]/register) prefix rows get zero positional embedding.
        valid = (row >= num_extra_tokens).astype(pe.dtype)       # (TS, 1)
        pe = pe * valid

    # Single full-width, lane-aligned store (no sub-slice / masked vst).
    o_ref[0] = (x_ref[0] + pe).astype(o_ref.dtype)


def _build_lane_constants(embed_dim):
    """(5, E) per-lane constants: omega, phase, obj-mask, x-mask, y-mask.

    PE lane layout (matches the module):
      [ sin(obj) E/4 | cos(obj) E/4 | sin(x) E/8 | cos(x) E/8 | sin(y) E/8 | cos(y) E/8 ]
    """
    e = embed_dim
    obj_dim = e // 4
    xy_dim = e // 8
    omega_obj = 1.0 / 10000.0 ** (jnp.arange(obj_dim, dtype=jnp.float32) / obj_dim)
    omega_xy = 1.0 / 10000.0 ** (jnp.arange(xy_dim, dtype=jnp.float32) / xy_dim)
    omega = jnp.concatenate(
        [omega_obj, omega_obj, omega_xy, omega_xy, omega_xy, omega_xy])
    half_pi = jnp.float32(math.pi / 2.0)
    phase = jnp.concatenate([
        jnp.zeros((obj_dim,), jnp.float32), jnp.full((obj_dim,), half_pi, jnp.float32),
        jnp.zeros((xy_dim,), jnp.float32), jnp.full((xy_dim,), half_pi, jnp.float32),
        jnp.zeros((xy_dim,), jnp.float32), jnp.full((xy_dim,), half_pi, jnp.float32)])
    m_obj = jnp.concatenate(
        [jnp.ones((e // 2,), jnp.float32), jnp.zeros((e // 2,), jnp.float32)])
    m_x = jnp.concatenate(
        [jnp.zeros((e // 2,), jnp.float32), jnp.ones((e // 4,), jnp.float32),
         jnp.zeros((e // 4,), jnp.float32)])
    m_y = jnp.concatenate(
        [jnp.zeros((3 * e // 4,), jnp.float32), jnp.ones((e // 4,), jnp.float32)])
    return jnp.stack([omega, phase, m_obj, m_x, m_y], axis=0)    # (5, E)


def absolute_positional_encoding(inputs_embeds, x_grid_object_ids, grid_size,
                                 num_extra_tokens, *, max_tile_rows=None):
    """JAX wrapper: pads object ids over the extra-token prefix, builds the tiny
    per-lane constant table, derives generation-appropriate tiling / VMEM limits
    and calls the fused Pallas kernel."""
    B, S_total, E = inputs_embeds.shape
    S = grid_size * grid_size
    assert S_total == S + num_extra_tokens
    assert E % 8 == 0, "Embed dimension must be divisible by 8 for APE+OPE"

    # ---- object ids, zero-padded over the extra-token prefix -> (B, S_total, 1) ----
    ids = x_grid_object_ids.astype(jnp.float32).reshape(B, S, 1)
    if num_extra_tokens > 0:
        ids = jnp.concatenate(
            [jnp.zeros((B, num_extra_tokens, 1), jnp.float32), ids], axis=1)

    consts = _build_lane_constants(E)                            # (5, E)

    # ---- tile sizing from the double-buffered VMEM working set ----
    itemsize = jnp.dtype(inputs_embeds.dtype).itemsize
    lane_e = pl.cdiv(E, 128) * 128                               # VMEM lane padding
    # per-row VMEM bytes: x block + out block + ids block (1 lane pads to 128)
    bytes_per_row = 2 * lane_e * itemsize + 128 * 4

    if max_tile_rows is None:
        try:
            vmem_cap = pltpu.get_tpu_info().vmem_capacity_bytes  # 128 MiB v5e/v6e, 64 MiB v7x
        except Exception:  # pragma: no cover - conservative (v7x) fallback
            vmem_cap = 64 * 1024 * 1024
        budget = vmem_cap // 4                                   # leave generous headroom
        max_tile_rows = min(2048, max(512, (budget // (2 * bytes_per_row)) // 8 * 8))
    assert max_tile_rows % 8 == 0

    ts = S_total if S_total <= max_tile_rows else max_tile_rows
    n_s_tiles = pl.cdiv(S_total, ts)
    # NOTE: when S_total % ts != 0 the trailing rows of the last tile compute on
    # padded/garbage ids; those rows are dropped by Pallas's out-of-bounds write
    # masking, so the result is still correct.

    # explicit VMEM limit derived from the double-buffered working set (+ headroom)
    vmem_limit = int(2 * ts * bytes_per_row + 2 * 8 * lane_e * 4) + (2 << 20)
    vmem_limit = min(max(vmem_limit, 4 << 20), 96 << 20)

    kernel = functools.partial(
        _ape_ope_kernel,
        num_extra_tokens=num_extra_tokens,
        tile_rows=ts,
        grid_size=grid_size,
    )

    # Grid: sequence tiles outermost, batch innermost; both axes parallel.
    return pl.pallas_call(
        kernel,
        out_shape=jax.ShapeDtypeStruct((B, S_total, E), inputs_embeds.dtype),
        grid=(n_s_tiles, B),
        in_specs=[
            pl.BlockSpec((1, ts, E), lambda j, b: (b, j, 0)),    # inputs_embeds
            pl.BlockSpec((1, ts, 1), lambda j, b: (b, j, 0)),    # object ids
            pl.BlockSpec((5, E), lambda j, b: (0, 0)),           # per-lane constants
        ],
        out_specs=pl.BlockSpec((1, ts, E), lambda j, b: (b, j, 0)),
        input_output_aliases={0: 0},                             # in-place add on the activation
        compiler_params=pltpu.CompilerParams(
            dimension_semantics=("parallel", "parallel"),
            vmem_limit_bytes=vmem_limit),
    )(inputs_embeds, ids, consts)


def _reference_jax(inputs_embeds, x_grid_object_ids, grid_size, num_extra_tokens):
    """Pure-JAX reference mirroring the PyTorch forward (OPE path, 'default' mixer)."""
    B, S_total, E = inputs_embeds.shape
    S = grid_size * grid_size
    obj_dim = E // 4
    xy_pos_dim = E // 8
    omega_xy = 1.0 / 10000.0 ** (jnp.arange(xy_pos_dim, dtype=jnp.float32) / xy_pos_dim)
    omega_obj = 1.0 / 10000.0 ** (jnp.arange(obj_dim, dtype=jnp.float32) / obj_dim)
    seq_h = jnp.arange(grid_size, dtype=jnp.float32)
    seq_w = jnp.arange(grid_size, dtype=jnp.float32)
    grid_x, grid_y = jnp.meshgrid(seq_w, seq_h, indexing="ij")
    gx = grid_x.reshape(-1)
    gy = grid_y.reshape(-1)
    out_x = jnp.einsum("n,d->nd", gx, omega_xy)
    out_y = jnp.einsum("n,d->nd", gy, omega_xy)
    x_pe = jnp.concatenate([jnp.sin(out_x), jnp.cos(out_x)], axis=1)
    y_pe = jnp.concatenate([jnp.sin(out_y), jnp.cos(out_y)], axis=1)
    x_pe = jnp.broadcast_to(x_pe[None], (B, S, E // 4))
    y_pe = jnp.broadcast_to(y_pe[None], (B, S, E // 4))
    ids = x_grid_object_ids.astype(jnp.float32).reshape(B, S)
    out_obj = ids[..., None] * omega_obj
    obj_pe = jnp.concatenate([jnp.sin(out_obj), jnp.cos(out_obj)], axis=-1)
    pos_embed = jnp.concatenate([obj_pe, x_pe, y_pe], axis=-1)
    if num_extra_tokens > 0:
        extra = jnp.zeros((B, num_extra_tokens, E), jnp.float32)
        pos_embed = jnp.concatenate([extra, pos_embed], axis=1)
    return inputs_embeds + pos_embed   # 'default' mixer, dropout identity (eval)


if __name__ == "__main__":
    # Small, module-consistent shapes.
    B = 2
    grid_size = 4                     # patch_embed.grid_size
    seq_len = grid_size * grid_size   # 16
    embed_dim = 32                    # divisible by 8 (APE+OPE requirement)
    num_extra_tokens = 2              # e.g. [cls] + 1 register token
    S_total = seq_len + num_extra_tokens

    key = jax.random.PRNGKey(0)
    k1, k2 = jax.random.split(key)
    inputs_embeds = jax.random.normal(k1, (B, S_total, embed_dim), jnp.float32)
    x_grid_object_ids = jax.random.randint(
        k2, (B, seq_len, 1), 0, 5).astype(jnp.float32)

    # Compute the reference first (the kernel output may alias its input buffer
    # when donated under jit; keep the comparison unambiguous).
    ref = _reference_jax(
        inputs_embeds, x_grid_object_ids, grid_size, num_extra_tokens)

    out = absolute_positional_encoding(
        inputs_embeds, x_grid_object_ids, grid_size, num_extra_tokens)
    out = jax.block_until_ready(out)

    assert out.shape == (B, S_total, embed_dim)
    assert jnp.allclose(out, ref, atol=1e-5, rtol=1e-5), "mismatch vs reference"

    # TODO(synk): training-mode dropout (ape_drop), the static-APE ('learn' /
    # precomputed '2dsincos') path and the non-'default' mixer strategies
    # (normalize / learnable scaling / layer_norm) are not implemented; the
    # configuration covered is OPE-enabled + mixer_strategy='default' in eval.
    print("KERNEL_OK")
</pallas_src>

<mosaic_0001>
module attributes {stable_mosaic.version = 11 : i64} {
  func.func @_ape_ope_kernel(%arg0: i32, %arg1: i32, %arg2: memref<1x18x32xf32, #tpu.memory_space<vmem>>, %arg3: memref<1x18x1xf32, #tpu.memory_space<vmem>>, %arg4: memref<5x32xf32, #tpu.memory_space<vmem>>, %arg5: memref<1x18x32xf32, #tpu.memory_space<vmem>>) attributes {dimension_semantics = [#tpu.dimension_semantics<parallel>, #tpu.dimension_semantics<parallel>], iteration_bounds = array<i64: 1, 2>, scalar_prefetch = 0 : i64, scratch_operands = 0 : i64, tpu.core_type = #tpu.core_type<tc>, window_params = [{transform_indices = @transform_0, window_bounds = array<i64: 1, 18, 32>}, {transform_indices = @transform_1, window_bounds = array<i64: 1, 18, 1>}, {pipeline_mode = #tpu.pipeline_mode<synchronous>, transform_indices = @transform_2, window_bounds = array<i64: 5, 32>}, {transform_indices = @transform_3, window_bounds = array<i64: 1, 18, 32>}]} {
    %c0 = arith.constant 0 : index
    %c0_0 = arith.constant 0 : index
    %0 = vector.load %arg4[%c0, %c0_0] : memref<5x32xf32, #tpu.memory_space<vmem>>, vector<5x32xf32>
    %1 = vector.extract_strided_slice %0 {offsets = [0, 0], sizes = [1, 32], strides = [1, 1]} : vector<5x32xf32> to vector<1x32xf32>
    %2 = vector.extract_strided_slice %0 {offsets = [1, 0], sizes = [1, 32], strides = [1, 1]} : vector<5x32xf32> to vector<1x32xf32>
    %3 = vector.extract_strided_slice %0 {offsets = [2, 0], sizes = [1, 32], strides = [1, 1]} : vector<5x32xf32> to vector<1x32xf32>
    %4 = vector.extract_strided_slice %0 {offsets = [3, 0], sizes = [1, 32], strides = [1, 1]} : vector<5x32xf32> to vector<1x32xf32>
    %5 = vector.extract_strided_slice %0 {offsets = [4, 0], sizes = [1, 32], strides = [1, 1]} : vector<5x32xf32> to vector<1x32xf32>
    %6 = tpu.iota {dimensions = array<i32: 0>} : vector<18x1xi32>
    %c18_i32 = arith.constant 18 : i32
    %7 = arith.muli %arg0, %c18_i32 : i32
    %8 = vector.broadcast %7 : i32 to vector<18x1xi32>
    %9 = arith.addi %6, %8 : vector<18x1xi32>
    %c2_i32 = arith.constant 2 : i32
    %10 = vector.broadcast %c2_i32 : i32 to vector<18x1xi32>
    %11 = arith.subi %9, %10 : vector<18x1xi32>
    %c0_i32 = arith.constant 0 : i32
    %12 = vector.broadcast %c0_i32 : i32 to vector<18x1xi32>
    %13 = arith.maxsi %11, %12 : vector<18x1xi32>
    %14 = arith.sitofp %13 : vector<18x1xi32> to vector<18x1xf32>
    %cst = arith.constant 5.000000e-01 : f32
    %15 = vector.broadcast %cst : f32 to vector<18x1xf32>
    %16 = arith.addf %14, %15 : vector<18x1xf32>
    %cst_1 = arith.constant 2.500000e-01 : f32
    %17 = vector.broadcast %cst_1 : f32 to vector<18x1xf32>
    %18 = arith.mulf %16, %17 : vector<18x1xf32>
    %19 = math.floor %18 : vector<18x1xf32>
    %cst_2 = arith.constant 4.000000e+00 : f32
    %20 = vector.broadcast %cst_2 : f32 to vector<18x1xf32>
    %21 = arith.mulf %19, %20 : vector<18x1xf32>
    %22 = arith.subf %14, %21 : vector<18x1xf32>
    %c0_3 = arith.constant 0 : index
    %c0_4 = arith.constant 0 : index
    %c0_5 = arith.constant 0 : index
    %23 = vector.load %arg3[%c0_3, %c0_4, %c0_5] : memref<1x18x1xf32, #tpu.memory_space<vmem>>, vector<1x18x1xf32>
    %24 = vector.shape_cast %23 : vector<1x18x1xf32> to vector<18x1xf32>
    %25 = vector.broadcast %24 : vector<18x1xf32> to vector<18x32xf32>
    %26 = vector.broadcast %3 : vector<1x32xf32> to vector<18x32xf32>
    %27 = arith.mulf %25, %26 : vector<18x32xf32>
    %28 = vector.broadcast %19 : vector<18x1xf32> to vector<18x32xf32>
    %29 = vector.broadcast %4 : vector<1x32xf32> to vector<18x32xf32>
    %30 = arith.mulf %28, %29 : vector<18x32xf32>
    %31 = arith.addf %27, %30 : vector<18x32xf32>
    %32 = vector.broadcast %22 : vector<18x1xf32> to vector<18x32xf32>
    %33 = vector.broadcast %5 : vector<1x32xf32> to vector<18x32xf32>
    %34 = arith.mulf %32, %33 : vector<18x32xf32>
    %35 = arith.addf %31, %34 : vector<18x32xf32>
    %36 = vector.broadcast %1 : vector<1x32xf32> to vector<18x32xf32>
    %37 = arith.mulf %35, %36 : vector<18x32xf32>
    %38 = vector.broadcast %2 : vector<1x32xf32> to vector<18x32xf32>
    %39 = arith.addf %37, %38 : vector<18x32xf32>
    %40 = math.sin %39 : vector<18x32xf32>
    %c2_i32_6 = arith.constant 2 : i32
    %41 = vector.broadcast %c2_i32_6 : i32 to vector<18x1xi32>
    %42 = arith.cmpi sge, %9, %41 : vector<18x1xi32>
    %43 = arith.extui %42 : vector<18x1xi1> to vector<18x1xi32>
    %44 = arith.sitofp %43 : vector<18x1xi32> to vector<18x1xf32>
    %45 = vector.broadcast %44 : vector<18x1xf32> to vector<18x32xf32>
    %46 = arith.mulf %40, %45 : vector<18x32xf32>
    %c0_7 = arith.constant 0 : index
    %c0_8 = arith.constant 0 : index
    %c0_9 = arith.constant 0 : index
    %47 = vector.load %arg2[%c0_7, %c0_8, %c0_9] : memref<1x18x32xf32, #tpu.memory_space<vmem>>, vector<1x18x32xf32>
    %48 = vector.shape_cast %47 : vector<1x18x32xf32> to vector<18x32xf32>
    %49 = arith.addf %48, %46 : vector<18x32xf32>
    %c0_10 = arith.constant 0 : index
    %c0_11 = arith.constant 0 : index
    %c0_12 = arith.constant 0 : index
    %50 = vector.load %arg5[%c0_10, %c0_11, %c0_12] : memref<1x18x32xf32, #tpu.memory_space<vmem>>, vector<1x18x32xf32>
    %51 = vector.shape_cast %50 : vector<1x18x32xf32> to vector<18x32xf32>
    %52 = vector.shape_cast %49 : vector<18x32xf32> to vector<1x18x32xf32>
    tpu.vector_store %arg5[%c0_10, %c0_11, %c0_12], %52 {strides = array<i32>} : memref<1x18x32xf32, #tpu.memory_space<vmem>>, vector<1x18x32xf32>,
    return
  }
  func.func @transform_0(%arg0: i32, %arg1: i32) -> (i32, i32, i32) {
    %c0_i32 = arith.constant 0 : i32
    %c0_i32_0 = arith.constant 0 : i32
    return %arg1, %arg0, %c0_i32 : i32, i32, i32
  }
  func.func @transform_1(%arg0: i32, %arg1: i32) -> (i32, i32, i32) {
    %c0_i32 = arith.constant 0 : i32
    %c0_i32_0 = arith.constant 0 : i32
    return %arg1, %arg0, %c0_i32 : i32, i32, i32
  }
  func.func @transform_2(%arg0: i32, %arg1: i32) -> (i32, i32) {
    %c0_i32 = arith.constant 0 : i32
    %c0_i32_0 = arith.constant 0 : i32
    %c0_i32_1 = arith.constant 0 : i32
    return %c0_i32, %c0_i32_0 : i32, i32
  }
  func.func @transform_3(%arg0: i32, %arg1: i32) -> (i32, i32, i32) {
    %c0_i32 = arith.constant 0 : i32
    %c0_i32_0 = arith.constant 0 : i32
    return %arg1, %arg0, %c0_i32 : i32, i32, i32
  }
}

</mosaic_0001>

<bundles_post_ra>
// kernel: tpu_custom_call.1
= control target key start
LH: loop header
LB: loop body
LE: loop exit
PB: predicated region body
PF: predicated region fallthrough
CT: control target
= control target key end

     0   :  { %s921_s12 = smov 0   ;;  %s923_s13 = smov 0   ;;  %s1146_s0 = inlined_call_operand.vmem [shape: f32[2,18,32], index: 0, kind: input, shape index: {}, may-alias: {0,3}]   ;;  %s1147_s1 = inlined_call_operand.vmem [shape: f32[2,18,1], index: 1, kind: input, shape index: {}]   ;;  %s1148_s2 = inlined_call_operand.vmem [shape: f32[5,32], index: 2, kind: input, shape index: {}]   ;;  %s1149_s3 = inlined_call_operand.vmem [shape: f32[2,18,32], index: 3, kind: output, shape index: {}, may-alias: {0,3}]  }
   0x1   :  { %s925_s14 = smov 0  }
   0x2 LB: > { %s22_s15 = sadd.s32 1, %s887_s13  ;;  %p786_p0 = scmp.ge.s32.totalorder %s891_s14, 1  ;;  %s891_s14 = sphi %s925_s14, %s13_s14   ;;  %s887_s13 = sphi %s923_s13, %s1153_s13   ;;  %s883_s12 = sphi %s921_s12, %s1152_s12  }
   0x3   : > { %p23_p1 = scmp.ge.s32.totalorder %s22_s15, 2  ;;  %p175_p2 = scmp.lt.s32.totalorder %s891_s14, 3 }
   0x5   : > { %s1155_s15 = smov (%p23_p1, %s22_s15), 0  ;;  %p176_p3 = pnand %p786_p0, %p175_p2 }
   0x6   : > { %p217_p4 = scmp.lt.s32.totalorder (!%p176_p3), %s883_s12, 1  ;;  %v893_v0 = vmov (!%p176_p3), 0   ;;  %v247_v4 = vlaneseq (!%p176_p3)  ;;  %v246_v24 = vld [vmem:[%s1148_s2] sm:$0x1f] (!%p176_p3) }
   0x7   : > { %179 = sbr.rel (%p176_p3) target bundleno = 268 (0x10c), region = 32  ;;  %856 = vset.pattern.permute.xlu1 (!%p176_p3), %v893_v0  ;;  %855 = vset.pattern.permute.xlu0 (!%p176_p3), %v893_v0 }
   0x8   : > { %v945_v5 = vshrl.u32 (!%p176_p3), %v247_v4, 7 }
   0xa   : > { %v250_v6 = vadd.s32 (!%p176_p3), 16, %v945_v5  ;;  %v790_v7 = vadd.s32 (!%p176_p3), 4294967294, %v945_v5  ;;  %v249_v9 = vadd.s32 (!%p176_p3), 8, %v945_v5  ;;  %v310_v23 = vsub.s32 (!%p176_p3), 3, %v945_v5 }
   0xb   : > { %v320_v26 = vsub.s32 (!%p176_p3), 4, %v945_v5  ;;  %v303_v27 = vsub.s32 (!%p176_p3), 2, %v945_v5  ;;  %v330_v37 = vsub.s32 (!%p176_p3), 0, %v945_v5  ;;  %v337_v40 = vsub.s32 (!%p176_p3), 1, %v945_v5 }
   0xc   : > { %v792_v8 = vadd.s32 (!%p176_p3), 4294967294, %v250_v6  ;;  %v793_v10 = vcvt.s32.f32 (!%p176_p3), %v790_v7  ;;  %vm259_vm0 = vcmp.gt.s32.totalorder (!%p176_p3), %v790_v7, 0  ;;  %v791_v12 = vadd.s32 (!%p176_p3), 4294967294, %v249_v9 }
   0xd   : > { %v311_v30 = vrot.slane (!%p176_p3), %v246_v24, %v310_v23  ;;  %v321_v32 = vrot.slane (!%p176_p3), %v246_v24, %v320_v26  ;;  %v304_v33 = vrot.slane (!%p176_p3), %v246_v24, %v303_v27  ;;  %v331_v47 = vrot.slane (!%p176_p3), %v246_v24, %v330_v37 }
   0xe   : > { %s1157_s12 = smov (!%p217_p4, %s883_s12), 1  ;;  %v267_v11 = vcvt.s32.f32 %v792_v8  ;;  %v794_v13 = vsel %vm259_vm0, %v793_v10, 0.0  ;;  %v266_v16 = vcvt.s32.f32 %v791_v12  ;;  %v338_v51 = vrot.slane %v246_v24, %v337_v40 }
   0xf   : > { %s939_s16 = smul.u32 24, %s1157_s12  ;;  %v268_v15 = vadd.f32 0.5, %v794_v13  ;;  %v894_v26 = vmov 683565275  }
  0x10   : > { %v270_v14 = vadd.f32 0.5, %v267_v11  ;;  %v269_v19 = vadd.f32 0.5, %v266_v16 }
  0x11   : > { %s234_s19 = scalar_lea.vmem %s1147_s1, %s939_s16  ;;  %v271_v18 = vmul.f32 0.25, %v268_v15  ;;  %s224_s24 = scalar_lea.vmem %s1146_s0, %s939_s16 }
  0x12   : > { %v285_v1 = vld [vmem:[%s234_s19 + $0x10] sm:$0x3]  ;;  %v283_v2 = vld [vmem:[%s234_s19] sm:$0xff]  ;;  %v284_v3 = vld [vmem:[%s234_s19 + $0x8] sm:$0xff]  ;;  %v273_v17 = vmul.f32 0.25, %v270_v14  ;;  %v272_v22 = vmul.f32 0.25, %v269_v19  ;;  %s1118_s27 = scalar_lea.vmem %s1149_s3, %s939_s16 }
  0x13   : > { %298 = vperm.xlu1 %856, %v285_v1   ;;  %288 = vperm.xlu0 %855, %v283_v2   ;;  %v274_v21 = vfloor.f32 %v271_v18 }
  0x14   : > { %v276_v20 = vfloor.f32 %v273_v17  ;;  %v275_v29 = vfloor.f32 %v272_v22 }
  0x15   : > { %v277_v28 = vmul.f32 4.0, %v274_v21  ;;  %v312_v38 = vmul.f32 %v311_v30, %v274_v21 }
  0x16   : > { %v279_v25 = vmul.f32 4.0, %v276_v20  ;;  %v278_v35 = vmul.f32 4.0, %v275_v29  ;;  %v314_v36 = vmul.f32 %v311_v30, %v276_v20  ;;  %v313_v50 = vmul.f32 %v311_v30, %v275_v29 }
  0x17   : > { %293 = vperm.xlu0 %855, %v284_v3   ;;  %v280_v34 = vsub.f32 %v794_v13, %v277_v28  ;;  %v895_v28 = vmov 2475754826   ;;  %v896_v30 = vmov 2131351028  }
  0x18   : > { %v282_v31 = vsub.f32 %v267_v11, %v279_v25  ;;  %v281_v46 = vsub.f32 %v266_v16, %v278_v35 }
  0x19   : > { %v322_v44 = vmul.f32 %v321_v32, %v280_v34  ;;  %v898_v34 = vmov 920167782  }
  0x1a   : > { %v324_v39 = vmul.f32 %v321_v32, %v282_v31  ;;  %v323_v55 = vmul.f32 %v321_v32, %v281_v46  ;;  %v897_v32 = vmov 2102212464  }
  0x92   : > { %v299_v41 = vpop.permute.xlu1 %298  ;;  %v289_v42 = vpop.permute.xlu0 %288 }
  0x93   : > { %v307_v43 = vmul.f32 %v304_v33, %v299_v41  ;;  %v305_v45 = vmul.f32 %v304_v33, %v289_v42 }
  0x95   : > { %v317_v48 = vadd.f32 %v314_v36, %v307_v43  ;;  %v315_v49 = vadd.f32 %v312_v38, %v305_v45  ;;  %v899_v43 = vmov 1326507024  }
  0x96   : > { %v294_v52 = vpop.permute.xlu0 %293 }
  0x97   : > { %v327_v53 = vadd.f32 %v324_v39, %v317_v48  ;;  %v325_v54 = vadd.f32 %v322_v44, %v315_v49  ;;  %v306_v56 = vmul.f32 %v304_v33, %v294_v52 }
  0x99   : > { %v334_v57 = vmul.f32 %v331_v47, %v327_v53  ;;  %v332_v58 = vmul.f32 %v331_v47, %v325_v54  ;;  %v316_v59 = vadd.f32 %v313_v50, %v306_v56 }
  0x9b   : > { %v958_v60 = vadd.f32 %v338_v51, %v334_v57  ;;  %v960_v61 = vadd.f32 %v338_v51, %v332_v58  ;;  %v326_v62 = vadd.f32 %v323_v55, %v316_v59 }
  0x9d   : > { %v550_v63 = vand.u32 2147483647, %v958_v60  ;;  %v553_v0 = vand.u32 2139095040, %v958_v60  ;;  %v342_v1 = vand.u32 2147483647, %v960_v61  ;;  %v345_v2 = vand.u32 2139095040, %v960_v61 }
  0x9e   : > { %v333_v4 = vmul.f32 %v331_v47, %v326_v62 }
  0x9f   : > { %v554_v3 = vshrl.u32 %v553_v0, 23  ;;  %v557_v6 = vand.u32 8388607, %v550_v63  ;;  %v346_v7 = vshrl.u32 %v345_v2, 23  ;;  %v349_v8 = vand.u32 8388607, %v342_v1 }
  0xa0   : > { %v970_v10 = vadd.f32 %v338_v51, %v333_v4 }
  0xa1   : > { %v803_v9 = vadd.s32 4294967169, %v554_v3  ;;  %v795_v11 = vadd.s32 4294967169, %v346_v7  ;;  %v558_v13 = vor.u32 8388608, %v557_v6  ;;  %v350_v14 = vor.u32 8388608, %v349_v8 }
  0xa2   : > { %v449_v16 = vand.u32 2139095040, %v970_v10 }
  0xa3   : > { %v560_v12 = vadd.s32 1, %v803_v9  ;;  %v352_v15 = vadd.s32 1, %v795_v11  ;;  %v973_v22 = vshll.u32 %v558_v13, 8  ;;  %v975_v24 = vshll.u32 %v350_v14, 8 }
  0xa4   : > { %v450_v18 = vshrl.u32 %v449_v16, 23 }
  0xa5   : > { %vm561_vm1 = vcmp.gt.s32.totalorder %v560_v12, 0  ;;  %vm353_vm2 = vcmp.gt.s32.totalorder %v352_v15, 0 }
  0xa6   : > { %v562_v17 = vsel %vm561_vm1, %v560_v12, 0  ;;  %v354_v20 = vsel %vm353_vm2, %v352_v15, 0  ;;  %v984_v37 = vadd.s32 4294967169, %v450_v18 }
  0xa7   : > { %v564_v19 = vand.u32 31, %v562_v17  ;;  %v563_v21 = vshrl.u32 %v562_v17, 5  ;;  %v356_v23 = vand.u32 31, %v354_v20  ;;  %v982_v36 = vshrl.u32 %v354_v20, 5 }
  0xa9   : > { %v565_v25 = vsub.s32 32, %v564_v19  ;;  %v567_v27 = vshll.u32 %v894_v26, %v564_v19  ;;  %v570_v29 = vshll.u32 %v895_v28, %v564_v19  ;;  %v573_v31 = vshll.u32 %v896_v30, %v564_v19 }
  0xaa   : > { %v576_v33 = vshll.u32 %v897_v32, %v564_v19  ;;  %v579_v35 = vshll.u32 %v898_v34, %v564_v19  ;;  %vm582_vm3 = vcmp.lt.s32.totalorder %v563_v21, 1  ;;  %vm583_vm4 = vcmp.lt.s32.totalorder %v563_v21, 2 }
  0xab   : > { %v566_v38 = vshrl.u32 %v894_v26, %v565_v25  ;;  %v568_v39 = vshrl.u32 %v895_v28, %v565_v25  ;;  %v571_v40 = vshrl.u32 %v896_v30, %v565_v25  ;;  %v574_v41 = vshrl.u32 %v897_v32, %v565_v25 }
  0xac   : > { %v577_v42 = vshrl.u32 %v898_v34, %v565_v25  ;;  %v580_v44 = vshrl.u32 %v899_v43, %v565_v25  ;;  %v357_v48 = vsub.s32 32, %v356_v23  ;;  %vm584_vm5 = vcmp.lt.s32.totalorder %v563_v21, 3 }
  0xad   : > { %v569_v45 = vor.u32 %v568_v39, %v567_v27  ;;  %v572_v46 = vor.u32 %v571_v40, %v570_v29  ;;  %v575_v47 = vor.u32 %v574_v41, %v573_v31  ;;  %vm585_vm6 = vcmp.lt.s32.totalorder %v563_v21, 4 }
  0xae   : > { %v578_v49 = vor.u32 %v577_v42, %v576_v33  ;;  %v581_v50 = vor.u32 %v580_v44, %v579_v35  ;;  %v359_v58 = vshll.u32 %v894_v26, %v356_v23  ;;  %v360_v0 = vshrl.u32 %v895_v28, %v357_v48 }
  0xaf   : > { %v586_v51 = vsel %vm582_vm3, %v566_v38, %v569_v45  ;;  %v587_v52 = vsel %vm585_vm6, %v575_v47, 2102212464  ;;  %v590_v53 = vsel %vm582_vm3, %v569_v45, %v572_v46  ;;  %v594_v54 = vsel %vm582_vm3, %v572_v46, %v575_v47 }
  0xb0   : > { %v588_v55 = vsel %vm584_vm5, %v572_v46, %v587_v52  ;;  %v591_v56 = vsel %vm585_vm6, %v578_v49, 920167782  ;;  %v595_v57 = vsel %vm585_vm6, %v581_v50, 1326507024  ;;  %v362_v2 = vshll.u32 %v895_v28, %v356_v23 }
  0xb1   : > { %v592_v59 = vsel %vm584_vm5, %v575_v47, %v591_v56  ;;  %v596_v62 = vsel %vm584_vm5, %v578_v49, %v595_v57  ;;  %v589_v3 = vsel %vm583_vm4, %v586_v51, %v588_v55  ;;  %v363_v7 = vshrl.u32 %v896_v30, %v357_v48 }
  0xb2   : > { %v593_v4 = vsel %vm583_vm4, %v590_v53, %v592_v59  ;;  %v597_v6 = vsel %vm583_vm4, %v594_v54, %v596_v62  ;;  %v361_v13 = vor.u32 %v360_v0, %v359_v58  ;;  %v365_v15 = vshll.u32 %v896_v30, %v356_v23 }
  0xb3   : > { %v1000_v8 = vmul.u32.u64.low %v973_v22, %v597_v6  ;;  %v1001_v9 = vmul.u32.u64.high %v973_v22, %v597_v6, %v1000_v8  ;;  %v1004_v11 = vmul.u32.u64.low %v973_v22, %v593_v4  ;;  %v1005_v12 = vmul.u32.u64.high %v973_v22, %v593_v4, %v1004_v11 }
  0xb4   : > { %v364_v14 = vor.u32 %v363_v7, %v362_v2  ;;  %v366_v16 = vshrl.u32 %v897_v32, %v357_v48  ;;  %v358_v17 = vshrl.u32 %v894_v26, %v357_v48  ;;  %v368_v18 = vshll.u32 %v897_v32, %v356_v23 }
  0xb5   : > { %v369_v19 = vshrl.u32 %v898_v34, %v357_v48  ;;  %v372_v20 = vshrl.u32 %v899_v43, %v357_v48  ;;  %v605_v21 = vmul.u32 %v973_v22, %v589_v3  ;;  %v371_v27 = vshll.u32 %v898_v34, %v356_v23 }
  0xb6   : > { %v367_v25 = vor.u32 %v366_v16, %v365_v15  ;;  %vm374_vm7 = vcmp.lt.s32.totalorder %v982_v36, 1  ;;  %vm607_vm8 = vc.u32 %v1001_v9, %v1004_v11  ;;  %v608_v29 = vadd.s32 1, %v1005_v12 }
  0xb7   : > { %v370_v31 = vor.u32 %v369_v19, %v368_v18  ;;  %vm375_vm9 = vcmp.lt.s32.totalorder %v982_v36, 2  ;;  %v373_v33 = vor.u32 %v372_v20, %v371_v27  ;;  %vm376_vm10 = vcmp.lt.s32.totalorder %v982_v36, 3 }
  0xb8   : > { %vm377_vm11 = vcmp.lt.s32.totalorder %v982_v36, 4  ;;  %v382_v35 = vsel %vm374_vm7, %v361_v13, %v364_v14  ;;  %v609_v22 = vsel %vm607_vm8, %v608_v29, %v1005_v12  ;;  %v386_v39 = vsel %vm374_vm7, %v364_v14, %v367_v25 }
  0xb9   : > { %v379_v38 = vsel %vm377_vm11, %v367_v25, 2102212464  ;;  %v383_v23 = vsel %vm377_vm11, %v370_v31, 920167782  ;;  %v610_v40 = vadd.s32 %v609_v22, %v605_v21  ;;  %v378_v41 = vsel %vm374_vm7, %v358_v17, %v361_v13 }
  0xba   : > { %v384_v42 = vsel %vm376_vm10, %v367_v25, %v383_v23  ;;  %v387_v44 = vsel %vm377_vm11, %v373_v33, 1326507024  ;;  %v380_v45 = vsel %vm376_vm10, %v364_v14, %v379_v38  ;;  %v456_v48 = vadd.s32 1, %v984_v37 }
  0xbb   : > { %v385_v46 = vsel %vm375_vm9, %v382_v35, %v384_v42  ;;  %v388_v47 = vsel %vm376_vm10, %v370_v31, %v387_v44  ;;  %v611_v49 = vadd.s32 536870912, %v610_v40  ;;  %v381_v56 = vsel %vm375_vm9, %v378_v41, %v380_v45 }
  0xbc   : > { %v389_v50 = vsel %vm375_vm9, %v386_v39, %v388_v47  ;;  %v1030_v51 = vmul.u32.u64.low %v975_v24, %v385_v46  ;;  %v1031_v52 = vmul.u32.u64.high %v975_v24, %v385_v46, %v1030_v51  ;;  %vm457_vm12 = vcmp.gt.s32.totalorder %v456_v48, 0 }
  0xbd   : > { %v1035_v53 = vmul.u32.u64.low %v975_v24, %v389_v50  ;;  %v1036_v54 = vmul.u32.u64.high %v975_v24, %v389_v50, %v1035_v53  ;;  %v1038_v55 = vshrl.u32 %v611_v49, 30  ;;  %v446_v37 = vand.u32 2147483647, %v970_v10 }
  0xbe   : > { %v458_v57 = vsel %vm457_vm12, %v456_v48, 0  ;;  %v400_v62 = vadd.s32 1, %v1031_v52  ;;  %v397_v0 = vmul.u32 %v975_v24, %v381_v56  ;;  %v606_v39 = vadd.s32 %v1004_v11, %v1001_v9 }
  0xbf   : > { %v460_v58 = vand.u32 31, %v458_v57  ;;  %v613_v59 = vshll.u32 %v1038_v55, 30  ;;  %vm399_vm13 = vc.u32 %v1036_v54, %v1030_v51  ;;  %v453_v36 = vand.u32 8388607, %v446_v37 }
  0xc0   : > { %v401_v4 = vsel %vm399_vm13, %v400_v62, %v1031_v52  ;;  %v459_v17 = vshrl.u32 %v458_v57, 5  ;;  %vm552_vm5 = vcmp.lt.s32.totalorder %v958_v60, 0  ;;  %vm551_vm6 = vcmp.le.f32.partialorder %v550_v63, 0.7853982 }
  0xc1   : > { %v461_v2 = vsub.s32 32, %v460_v58  ;;  %v614_v3 = vsub.s32 %v610_v40, %v613_v59  ;;  %v402_v6 = vadd.s32 %v401_v4, %v397_v0  ;;  %v454_v14 = vor.u32 8388608, %v453_v36 }
  0xc2   : > { %v463_v18 = vshll.u32 %v894_v26, %v460_v58  ;;  %v466_v21 = vshll.u32 %v895_v28, %v460_v58  ;;  %v469_v25 = vshll.u32 %v896_v30, %v460_v58  ;;  %v472_v33 = vshll.u32 %v897_v32, %v460_v58 }
  0xc3   : > { %v616_v7 = vsub.s32 0, %v614_v3  ;;  %v403_v8 = vadd.s32 536870912, %v402_v6  ;;  %v464_v12 = vshrl.u32 %v895_v28, %v461_v2  ;;  %v467_v15 = vshrl.u32 %v896_v30, %v461_v2 }
  0xc4   : > { %v470_v24 = vshrl.u32 %v897_v32, %v461_v2  ;;  %v473_v19 = vshrl.u32 %v898_v34, %v461_v2  ;;  %v476_v27 = vshrl.u32 %v899_v43, %v461_v2  ;;  %v475_v23 = vshll.u32 %v898_v34, %v460_v58 }
  0xc5   : > { %v804_v13 = vmin.u32 %v616_v7, %v614_v3  ;;  %v1054_v16 = vshrl.u32 %v403_v8, 30  ;;  %v465_v31 = vor.u32 %v464_v12, %v463_v18  ;;  %v468_v22 = vor.u32 %v467_v15, %v466_v21 }
  0xc6   : > { %v471_v38 = vor.u32 %v470_v24, %v469_v25  ;;  %v474_v41 = vor.u32 %v473_v19, %v472_v33  ;;  %v494_v28 = vshll.u32 %v454_v14, 8  ;;  %v462_v30 = vshrl.u32 %v894_v26, %v461_v2 }
  0xc7   : > { %v618_v20 = vclz %v804_v13  ;;  %v405_v29 = vshll.u32 %v1054_v16, 30  ;;  %v477_v43 = vor.u32 %v476_v27, %v475_v23  ;;  %vm478_vm15 = vcmp.lt.s32.totalorder %v459_v17, 1 }
  0xc8   : > { %vm480_vm0 = vcmp.lt.s32.totalorder %v459_v17, 3  ;;  %vm481_vm1 = vcmp.lt.s32.totalorder %v459_v17, 4  ;;  %v486_v34 = vsel %vm478_vm15, %v465_v31, %v468_v22  ;;  %v490_v11 = vsel %vm478_vm15, %v468_v22, %v471_v38 }
  0xc9   : > { %v805_v35 = vadd.s32 4294967294, %v618_v20  ;;  %v406_v40 = vsub.s32 %v402_v6, %v405_v29  ;;  %v483_v46 = vsel %vm481_vm1, %v471_v38, 2102212464  ;;  %v487_v9 = vsel %vm481_vm1, %v474_v41, 920167782 }
  0xca   : > { %v488_v26 = vsel %vm480_vm0, %v471_v38, %v487_v9  ;;  %v491_v52 = vsel %vm481_vm1, %v477_v43, 1326507024  ;;  %vm479_vm2 = vcmp.lt.s32.totalorder %v459_v17, 2  ;;  %v482_v56 = vsel %vm478_vm15, %v462_v30, %v465_v31 }
  0xcb   : > { %vm806_vm14 = vcmp.lt.s32.totalorder %v805_v35, 0  ;;  %v408_v44 = vsub.s32 0, %v406_v40  ;;  %v484_v57 = vsel %vm480_vm0, %v468_v22, %v483_v46  ;;  %v489_v62 = vsel %vm479_vm2, %v486_v34, %v488_v26 }
  0xcc   : > { %v621_v42 = vsel %vm806_vm14, 0, %v805_v35  ;;  %v492_v0 = vsel %vm480_vm0, %v474_v41, %v491_v52  ;;  %v1073_v4 = vmul.u32.u64.low %v494_v28, %v489_v62  ;;  %v1074_v36 = vmul.u32.u64.high %v494_v28, %v489_v62, %v1073_v4  ;;  %v668_v62 = vld [vmem:[%s224_s24 + $0x10] sm:$0x3] }
  0xcd   : > { %v622_v32 = vsub.s32 32, %v621_v42  ;;  %v626_v45 = vsub.s32 4294967266, %v621_v42  ;;  %v623_v47 = vshll.u32 %v614_v3, %v621_v42  ;;  %v796_v48 = vmin.u32 %v408_v44, %v406_v40 }
  0xce   : > { %v493_v3 = vsel %vm479_vm2, %v490_v11, %v492_v0  ;;  %v485_v12 = vsel %vm479_vm2, %v482_v56, %v484_v57  ;;  %v398_v24 = vadd.s32 %v1030_v51, %v1036_v54  ;;  %v504_v19 = vadd.s32 1, %v1074_v36 }
  0xcf   : > { %v624_v49 = vshrl.u32 %v606_v39, %v622_v32  ;;  %v627_v50 = vadd.s32 127, %v626_v45  ;;  %v410_v53 = vclz %v796_v48  ;;  %v636_v21 = vsub.s32 4, %v1038_v55 }
  0xd0   : > { %v1077_v7 = vmul.u32.u64.low %v494_v28, %v493_v3  ;;  %v1078_v8 = vmul.u32.u64.high %v494_v28, %v493_v3, %v1077_v7  ;;  %v501_v25 = vmul.u32 %v494_v28, %v485_v12  ;;  %v428_v45 = vsub.s32 4, %v1054_v16 }
  0xd1   : > { %v625_v58 = vor.u32 %v624_v49, %v623_v47  ;;  %v628_v59 = vshll.u32 %v627_v50, 23  ;;  %v797_v2 = vadd.s32 4294967294, %v410_v53  ;;  %v637_v23 = vsel %vm552_vm5, %v636_v21, %v1038_v55 }
  0xd2   : > { %vm503_vm4 = vc.u32 %v1078_v8, %v1073_v4  ;;  %v639_v30 = vsel %vm551_vm6, 0, %v637_v23  ;;  %vm344_vm7 = vcmp.lt.s32.totalorder %v960_v61, 0  ;;  %vm1099_vm8 = vcmp.le.f32.partialorder %v342_v1, 0.7853982 }
  0xd3   : > { %v629_v6 = vor.u32 4788187, %v628_v59  ;;  %vm798_vm3 = vcmp.lt.s32.totalorder %v797_v2, 0  ;;  %v632_v14 = vcvt.s32.f32 %v625_v58  ;;  %v505_v33 = vsel %vm503_vm4, %v504_v19, %v1074_v36  ;;  %v666_v36 = vld [vmem:[%s224_s24] sm:$0xff] }
  0xd4   : > { %v413_v15 = vsel %vm798_vm3, 0, %v797_v2  ;;  %v506_v22 = vadd.s32 %v505_v33, %v501_v25  ;;  %v643_v63 = vadd.s32 3, %v639_v30  ;;  %v429_v9 = vsel %vm344_vm7, %v428_v45, %v1054_v16 }
  0xd5   : > { %v630_v13 = vand.u32 2147483647, %v629_v6  ;;  %v414_v17 = vsub.s32 32, %v413_v15  ;;  %v418_v18 = vsub.s32 4294967266, %v413_v15  ;;  %v415_v27 = vshll.u32 %v406_v40, %v413_v15  ;;  %v667_v6 = vld [vmem:[%s224_s24 + $0x8] sm:$0xff] }
  0xd6   : > { %v507_v39 = vadd.s32 536870912, %v506_v22  ;;  %v644_v11 = vand.u32 3, %v643_v63  ;;  %v431_v52 = vsel %vm1099_vm8, 0, %v429_v9  ;;  %vm675_vm13 = vcmask 254976  }
  0xd7   : > { %v633_v20 = vmul.f32 %v632_v14, %v630_v13  ;;  %v416_v29 = vshrl.u32 %v398_v24, %v414_v17  ;;  %v419_v31 = vadd.s32 127, %v418_v18  ;;  %v435_v59 = vadd.s32 3, %v431_v52 }
  0xd8   : > { %v1092_v28 = vshrl.u32 %v507_v39, 30  ;;  %vm649_vm9 = vcmp.eq.s32.totalorder %v644_v11, 2  ;;  %vm646_vm10 = vcmp.eq.s32.totalorder %v644_v11, 0  ;;  %vm645_vm11 = vcmp.lt.s32.totalorder %v644_v11, 2 }
  0xd9   : > { %v634_v35 = vxor.u32 2147483648, %v633_v20  ;;  %v417_v51 = vor.u32 %v416_v29, %v415_v27  ;;  %v420_v54 = vshll.u32 %v419_v31, 23  ;;  %vm642_vm14 = vweird.f32 %v958_v60 }
  0xda   : > { %v509_v44 = vshll.u32 %v1092_v28, 30  ;;  %v502_v12 = vadd.s32 %v1073_v4, %v1078_v8  ;;  %v436_v24 = vand.u32 3, %v435_v59  ;;  %vm654_vm15 = vcmp.ge.s32.totalorder %v945_v5, 2 }
  0xdb   : > { %v635_v38 = vsel %vm552_vm5, %v634_v35, %v633_v20  ;;  %v421_v40 = vor.u32 4788187, %v420_v54  ;;  %v424_v42 = vcvt.s32.f32 %v417_v51  ;;  %v900_v31 = vmov 0.0  }
  0xdc   : > { %v638_v41 = vsel %vm551_vm6, %v958_v60, %v635_v38  ;;  %v510_v46 = vsub.s32 %v506_v22, %v509_v44  ;;  %vm441_vm0 = vcmp.eq.s32.totalorder %v436_v24, 2  ;;  %vm438_vm1 = vcmp.eq.s32.totalorder %v436_v24, 0 }
  0xdd   : > { %857 = vcosq.f32 %v638_v41  ;;  %v422_v43 = vand.u32 2147483647, %v421_v40  ;;  %v807_v33 = vsel %vm654_vm15, 1.0, %v900_v31  ;;  %vm437_vm2 = vcmp.lt.s32.totalorder %v436_v24, 2 }
  0xde   : > { %859 = vsinq.f32 %v638_v41  ;;  %v512_v34 = vsub.s32 0, %v510_v46  ;;  %vm434_vm3 = vweird.f32 %v960_v61  ;;  %v532_v39 = vsub.s32 4, %v1092_v28 }
  0xdf   : > { %v425_v32 = vmul.f32 %v424_v42, %v422_v43  ;;  %vm672_vm4 = vcmask 261120   ;;  %vm448_vm5 = vcmp.lt.s32.totalorder %v970_v10, 0  ;;  %vm447_vm6 = vcmp.le.f32.partialorder %v446_v37, 0.7853982 }
  0xe0   : > { %v800_v50 = vmin.u32 %v512_v34, %v510_v46 }
  0xe1   : > { %v426_v55 = vxor.u32 2147483648, %v425_v32 }
  0xe2   : > { %v514_v53 = vclz %v800_v50 }
  0xe3   : > { %v427_v48 = vsel %vm344_vm7, %v426_v55, %v425_v32 }
  0xe4   : > { %v430_v49 = vsel %vm1099_vm8, %v960_v61, %v427_v48  ;;  %v801_v57 = vadd.s32 4294967294, %v514_v53  ;;  %v533_v61 = vsel %vm448_vm5, %v532_v39, %v1092_v28 }
  0xe5   : > { %861 = vcosq.f32 %v430_v49  ;;  %v535_v42 = vsel %vm447_vm6, 0, %v533_v61 }
  0xe6   : > { %863 = vsinq.f32 %v430_v49  ;;  %vm802_vm12 = vcmp.lt.s32.totalorder %v801_v57, 0  ;;  %v539_v44 = vadd.s32 3, %v535_v42 }
  0xe7   : > { %v858_v26 = vpop.eup %857  ;;  %v517_v3 = vsel %vm802_vm12, 0, %v801_v57 }
  0xe8   : > { %v860_v1 = vpop.eup %859  ;;  %v650_v16 = vxor.u32 2147483648, %v858_v26  ;;  %v518_v13 = vsub.s32 32, %v517_v3  ;;  %v522_v14 = vsub.s32 4294967266, %v517_v3  ;;  %v519_v17 = vshll.u32 %v510_v46, %v517_v3 }
  0xe9   : > { %v647_v56 = vxor.u32 2147483648, %v860_v1  ;;  %v540_v32 = vand.u32 3, %v539_v44 }
  0xea   : > { %v651_v58 = vsel %vm649_vm9, %v650_v16, %v860_v1  ;;  %v520_v60 = vshrl.u32 %v502_v12, %v518_v13  ;;  %v523_v18 = vadd.s32 127, %v522_v14 }
  0xeb   : > { %v648_v0 = vsel %vm646_vm10, %v858_v26, %v647_v56  ;;  %vm545_vm7 = vcmp.eq.s32.totalorder %v540_v32, 2  ;;  %vm542_vm8 = vcmp.eq.s32.totalorder %v540_v32, 0  ;;  %vm541_vm9 = vcmp.lt.s32.totalorder %v540_v32, 2 }
  0xec   : > { %v652_v2 = vsel %vm645_vm11, %v648_v0, %v651_v58  ;;  %v521_v25 = vor.u32 %v520_v60, %v519_v17  ;;  %v524_v27 = vshll.u32 %v523_v18, 23  ;;  %vm538_vm10 = vweird.f32 %v970_v10 }
  0xed   : > { %v653_v7 = vsel %vm642_vm14, nan, %v652_v2 }
  0xee   : > { %v671_v15 = vadd.f32 %v668_v62, %v653_v7  ;;  %v525_v8 = vor.u32 4788187, %v524_v27  ;;  %v528_v54 = vcvt.s32.f32 %v521_v25 }
  0xef   : > { %v862_v19 = vpop.eup %861 }
  0xf0   : > { %676 = vst.msk [vmem:[%s1118_s27 + $0x10] sm:$0x3] %vm675_vm13, %v671_v15  ;;  %v864_v20 = vpop.eup %863  ;;  %v442_v21 = vxor.u32 2147483648, %v862_v19  ;;  %v526_v51 = vand.u32 2147483647, %v525_v8 }
  0xf1   : > { %v439_v29 = vxor.u32 2147483648, %v864_v20 }
  0xf2   : > { %v443_v4 = vsel %vm441_vm0, %v442_v21, %v864_v20  ;;  %v529_v23 = vmul.f32 %v528_v54, %v526_v51 }
  0xf3   : > { %v440_v35 = vsel %vm438_vm1, %v862_v19, %v439_v29 }
  0xf4   : > { %v444_v22 = vsel %vm437_vm2, %v440_v35, %v443_v4  ;;  %v530_v40 = vxor.u32 2147483648, %v529_v23 }
  0xf5   : > { %v445_v5 = vsel %vm434_vm3, nan, %v444_v22 }
  0xf6   : > { %v663_v38 = vmul.f32 %v807_v33, %v445_v5  ;;  %v531_v30 = vsel %vm448_vm5, %v530_v40, %v529_v23 }
  0xf7   : > { %v534_v43 = vsel %vm447_vm6, %v970_v10, %v531_v30 }
  0xf8   : > { %v669_v41 = vadd.f32 %v666_v36, %v663_v38  ;;  %865 = vcosq.f32 %v534_v43 }
  0xf9   : > { %867 = vsinq.f32 %v534_v43 }
  0xfa   : > { %673 = vst.msk [vmem:[%s1118_s27] sm:$0xff] %vm672_vm4, %v669_v41 }
 0x102   : > { %v866_v45 = vpop.eup %865 }
 0x103   : > { %v868_v63 = vpop.eup %867  ;;  %v546_v46 = vxor.u32 2147483648, %v866_v45 }
 0x104   : > { %v543_v55 = vxor.u32 2147483648, %v868_v63 }
 0x105   : > { %v547_v34 = vsel %vm545_vm7, %v546_v46, %v868_v63 }
 0x106   : > { %v544_v37 = vsel %vm542_vm8, %v866_v45, %v543_v55 }
 0x107   : > { %v548_v28 = vsel %vm541_vm9, %v544_v37, %v547_v34 }
 0x108   : > { %v549_v47 = vsel %vm538_vm10, nan, %v548_v28 }
 0x109   : > { %v670_v48 = vadd.f32 %v667_v6, %v549_v47 }
 0x10b   : > { %674 = vst.msk [vmem:[%s1118_s27 + $0x8] sm:$0xff] %vm672_vm4, %v670_v48 }
 0x10c PF: > { %s13_s14 = sadd.s32 1, %s891_s14   ;;  %s1152_s12 = smov %s887_s13 }
 0x10d   : > { %p10_p5 = scmp.ge.s32.totalorder %s13_s14, 4   ;;  %s1153_s13 = smov %s1155_s15 }
 0x10f   :  { %12 = sbr.rel (!%p10_p5) target bundleno = 2 (0x2), region = 65 }

</bundles_post_ra>
